<compile_context>
chip_gen: v7x
topology: tpu7x:2x2x1
jax: 0.10.0
libtpu: 0.0.40
codegen_flags: <defaults>
</compile_context>

<pallas_src>
import functools

import numpy as np
import jax
import jax.numpy as jnp
from jax.experimental import pallas as pl
from jax.experimental.pallas import tpu as pltpu


# ----------------------------------------------------------------------------
# Pallas kernels (elementwise, HBM-bandwidth bound — VALU has large slack,
# so the arithmetic is intentionally left simple)
# ----------------------------------------------------------------------------
def _mask_mix_kernel(mask_ref, enc_ref, cov_ref, out_ref):
    # mask_ref: (1, block_hw) mask in {0,1}, shared by every row tile.
    # enc/cov/out: (block_rows, block_hw) tiles.
    # out = cov + (enc - cov) * mask  ==  enc*mask + cov*(1-mask)
    m = mask_ref[...]
    cov = cov_ref[...]
    out_ref[...] = cov + (enc_ref[...] - cov) * m


def _quant_kernel(enc_ref, out_ref):
    # Images assumed in [-1, 1]; 8-bit round-trip quantization.
    x = enc_ref[...].astype(jnp.float32)
    q = jnp.round(jnp.clip((x + 1.0) * 127.5, 0.0, 255.0))
    out_ref[...] = (q * (1.0 / 127.5) - 1.0).astype(out_ref.dtype)


# ----------------------------------------------------------------------------
# Generation-aware tiling plan
# ----------------------------------------------------------------------------
def _round_down(x, m):
    return (x // m) * m


@functools.lru_cache(maxsize=None)
def _vmem_plan():
    """(per_array_tile_cap_bytes, scoped_vmem_limit_bytes), generation aware."""
    cap = 64 * 1024 * 1024  # conservative default: assume a 64 MiB-VMEM part
    try:
        info = pltpu.get_tpu_info()
        cap = int(getattr(info, "vmem_capacity_bytes", cap)) or cap
    except Exception:
        pass
    if cap <= 64 * 1024 * 1024:
        # v7x-class: 64 MiB physical VMEM per TensorCore -> keep ~16 MiB headroom.
        return 6 * 1024 * 1024, 48 * 1024 * 1024
    # v5e / v6e: 128 MiB physical VMEM.
    return 10 * 1024 * 1024, 80 * 1024 * 1024


def _compiler_params():
    _, vmem_limit = _vmem_plan()
    return pltpu.CompilerParams(
        dimension_semantics=("parallel", "parallel"),
        vmem_limit_bytes=vmem_limit,
    )


def _tile_plan(rows, hw, itemsize):
    """2-D (rows x HW) tile plan: (block_rows, block_hw, grid_rows, grid_hw).

    Tiles respect the (8, 128) divisibility rule (or take the full extent),
    stay under the generation-aware per-array cap so that 3 streamed arrays
    x 2 pipeline buffers fit scoped VMEM, and the grid has >= 2 steps whenever
    either axis can legally be split (so v7x's two TensorCores both run).
    """
    cap_bytes, _ = _vmem_plan()
    cap_elems = max(8 * 128, cap_bytes // itemsize)

    # Lane (HW) axis: multiples of 128, or the full extent if not divisible.
    if hw % 128 == 0:
        block_hw = min(hw, max(128, _round_down(cap_elems // 8, 128)))
    else:
        block_hw = hw

    # Sublane (row) axis: multiples of 8, or the full extent if not divisible.
    if rows % 8 == 0:
        block_rows = min(rows, max(8, _round_down(cap_elems // block_hw, 8)))
    else:
        block_rows = rows

    # Megacore: make sure both TensorCores get work when a split is legal.
    if pl.cdiv(rows, block_rows) * pl.cdiv(hw, block_hw) < 2:
        if rows % 16 == 0:
            block_rows = rows // 2          # still a multiple of 8
        elif hw % 256 == 0:
            block_hw = hw // 2              # still a multiple of 128

    return block_rows, block_hw, pl.cdiv(rows, block_rows), pl.cdiv(hw, block_hw)


# ----------------------------------------------------------------------------
# Cached, jitted pallas_call wrappers (built once per (shape, dtype))
# ----------------------------------------------------------------------------
@functools.lru_cache(maxsize=None)
def _mask_mix_fn(shape, dtype_name):
    n, c, h, w = shape
    rows, hw = n * c, h * w
    dtype = np.dtype(dtype_name)
    br, bhw, gr, ghw = _tile_plan(rows, hw, dtype.itemsize)

    call = pl.pallas_call(
        _mask_mix_kernel,
        out_shape=jax.ShapeDtypeStruct((rows, hw), dtype),
        grid=(gr, ghw),
        in_specs=[
            pl.BlockSpec((1, bhw), lambda i, j: (0, j)),    # shared mask row
            pl.BlockSpec((br, bhw), lambda i, j: (i, j)),   # encoded
            pl.BlockSpec((br, bhw), lambda i, j: (i, j)),   # cover
        ],
        out_specs=pl.BlockSpec((br, bhw), lambda i, j: (i, j)),
        compiler_params=_compiler_params(),
    )

    def fn(enc, cov, mask_row):
        out = call(mask_row.astype(dtype),
                   enc.reshape(rows, hw), cov.reshape(rows, hw))
        return out.reshape(shape)

    return jax.jit(fn)


@functools.lru_cache(maxsize=None)
def _quantize_fn(shape, dtype_name):
    n, c, h, w = shape
    rows, hw = n * c, h * w
    dtype = np.dtype(dtype_name)
    br, bhw, gr, ghw = _tile_plan(rows, hw, dtype.itemsize)

    call = pl.pallas_call(
        _quant_kernel,
        out_shape=jax.ShapeDtypeStruct((rows, hw), dtype),
        grid=(gr, ghw),
        in_specs=[pl.BlockSpec((br, bhw), lambda i, j: (i, j))],
        out_specs=pl.BlockSpec((br, bhw), lambda i, j: (i, j)),
        compiler_params=_compiler_params(),
    )

    def fn(enc):
        return call(enc.reshape(rows, hw)).reshape(shape)

    return jax.jit(fn)


# ----------------------------------------------------------------------------
# Noise layers (host-side glue matching the PyTorch reference semantics)
# ----------------------------------------------------------------------------
class Identity:
    def __call__(self, encoded_and_cover):
        enc, cov = encoded_and_cover
        # Pure pass-through: no kernel, no HBM round-trip.
        return [enc, cov]


class do_dropout:
    """HiDDeN dropout: per-pixel Bernoulli(keep) mix of encoded and cover."""

    def __init__(self, keep_ratio_range, seed=1):
        self.lo, self.hi = float(keep_ratio_range[0]), float(keep_ratio_range[1])
        self._rng = np.random.RandomState(seed)

    def __call__(self, encoded_and_cover):
        enc, cov = encoded_and_cover
        n, c, h, w = enc.shape
        keep = self._rng.uniform(self.lo, self.hi)
        # One HxW Bernoulli(keep) mask shared across batch and channels,
        # generated host-side exactly like the numpy-based reference.
        mask = (self._rng.rand(1, h * w) < keep).astype(np.float32)
        fn = _mask_mix_fn(tuple(enc.shape), np.dtype(enc.dtype).name)
        return [fn(enc, cov, mask), cov]


class do_cropout:
    """HiDDeN cropout: keep encoded inside a random rectangle, cover outside."""

    def __init__(self, ratio_range, seed=2):
        self.lo, self.hi = float(ratio_range[0]), float(ratio_range[1])
        self._rng = np.random.RandomState(seed)

    def __call__(self, encoded_and_cover):
        enc, cov = encoded_and_cover
        n, c, h, w = enc.shape
        r = np.sqrt(self._rng.uniform(self.lo, self.hi))
        rh, rw = max(1, int(round(r * h))), max(1, int(round(r * w)))
        h0 = int(self._rng.randint(0, h - rh + 1))
        w0 = int(self._rng.randint(0, w - rw + 1))
        mask2d = np.zeros((h, w), dtype=np.float32)
        mask2d[h0:h0 + rh, w0:w0 + rw] = 1.0
        fn = _mask_mix_fn(tuple(enc.shape), np.dtype(enc.dtype).name)
        return [fn(enc, cov, mask2d.reshape(1, h * w)), cov]


class Quantization:
    def __call__(self, encoded_and_cover):
        enc, cov = encoded_and_cover
        fn = _quantize_fn(tuple(enc.shape), np.dtype(enc.dtype).name)
        return [fn(enc), cov]


# ----------------------------------------------------------------------------
# Noiser: random choice among configured noise layers (host-side, like torch)
# ----------------------------------------------------------------------------
basic_noise = ['resize', 'crop', 'cropout', 'dropout', 'jpeg', 'quant', 'identity']


class Noiser:
    def __init__(self, noise_layers, seed=0):
        self._rng = np.random.RandomState(seed)
        self.noise_layers = [Identity()]
        for k, v in noise_layers.items():
            if k not in basic_noise:
                raise ValueError('Wrong noise layer type {}'.format(k))
            elif k == 'dropout':
                self.noise_layers.append(do_dropout(v))
            elif k == 'cropout':
                self.noise_layers.append(do_cropout(v))
            elif k == 'quant':
                self.noise_layers.append(Quantization())
            elif k == 'identity':
                pass
            else:
                # TODO(synk): 'resize', 'crop', 'jpeg' sub-layers not translated
                # (source not provided / no clean Pallas equivalent); skipped.
                pass

    def __call__(self, encoded_and_cover):
        random_noise_layer = self._rng.choice(self.noise_layers, 1)[0]
        return random_noise_layer(encoded_and_cover)


if __name__ == "__main__":
    key = jax.random.PRNGKey(0)
    k_enc, k_cov = jax.random.split(key)
    N, C, H, W = 2, 4, 16, 16
    encoded = jax.random.uniform(k_enc, (N, C, H, W), jnp.float32, -1.0, 1.0)
    cover = jax.random.uniform(k_cov, (N, C, H, W), jnp.float32, -1.0, 1.0)

    noiser = Noiser({'dropout': [0.3, 0.5],
                     'cropout': [0.4, 0.6],
                     'quant': {},
                     'identity': {}}, seed=0)

    # Exercise every layer once (correctness smoke), then the Noiser forward.
    for layer in noiser.noise_layers:
        out_enc, out_cov = layer([encoded, cover])
        out_enc = jax.block_until_ready(out_enc)
        assert out_enc.shape == encoded.shape and out_enc.dtype == encoded.dtype
        assert bool(jnp.all(jnp.isfinite(out_enc)))

    # Reference check: quantization against pure-jnp math.
    quant_out, _ = Quantization()([encoded, cover])
    quant_ref = jnp.round(jnp.clip((encoded + 1.0) * 127.5, 0.0, 255.0)) / 127.5 - 1.0
    assert bool(jnp.allclose(jax.block_until_ready(quant_out), quant_ref, atol=1e-5))

    # Reference check: mask-mix kernel via the dropout path (replay the RNG).
    drop = do_dropout([0.3, 0.5], seed=7)
    mix_out, _ = drop([encoded, cover])
    rng = np.random.RandomState(7)
    keep = rng.uniform(0.3, 0.5)
    mask = (rng.rand(1, H * W) < keep).astype(np.float32).reshape(1, 1, H, W)
    mix_ref = cover + (encoded - cover) * jnp.asarray(mask)
    assert bool(jnp.allclose(jax.block_until_ready(mix_out), mix_ref, atol=1e-6))

    noised_enc, noised_cov = noiser([encoded, cover])
    jax.block_until_ready(noised_enc)
    jax.block_until_ready(noised_cov)
    assert noised_enc.shape == (N, C, H, W)

    print("KERNEL_OK")
</pallas_src>

<mosaic_0001>
module attributes {stable_mosaic.version = 11 : i64} {
  func.func @_mask_mix_kernel(%arg0: i32, %arg1: i32, %arg2: memref<1x128xf32, #tpu.memory_space<vmem>>, %arg3: memref<8x128xf32, #tpu.memory_space<vmem>>, %arg4: memref<8x128xf32, #tpu.memory_space<vmem>>, %arg5: memref<8x128xf32, #tpu.memory_space<vmem>>) attributes {dimension_semantics = [#tpu.dimension_semantics<parallel>, #tpu.dimension_semantics<parallel>], iteration_bounds = array<i64: 1, 2>, scalar_prefetch = 0 : i64, scratch_operands = 0 : i64, tpu.core_type = #tpu.core_type<tc>, window_params = [{transform_indices = @transform_0, window_bounds = array<i64: 1, 128>}, {transform_indices = @transform_1, window_bounds = array<i64: 8, 128>}, {transform_indices = @transform_2, window_bounds = array<i64: 8, 128>}, {transform_indices = @transform_3, window_bounds = array<i64: 8, 128>}]} {
    %c0 = arith.constant 0 : index
    %c0_0 = arith.constant 0 : index
    %0 = vector.load %arg2[%c0, %c0_0] : memref<1x128xf32, #tpu.memory_space<vmem>>, vector<1x128xf32>
    %c0_1 = arith.constant 0 : index
    %c0_2 = arith.constant 0 : index
    %1 = vector.load %arg4[%c0_1, %c0_2] : memref<8x128xf32, #tpu.memory_space<vmem>>, vector<8x128xf32>
    %c0_3 = arith.constant 0 : index
    %c0_4 = arith.constant 0 : index
    %2 = vector.load %arg3[%c0_3, %c0_4] : memref<8x128xf32, #tpu.memory_space<vmem>>, vector<8x128xf32>
    %3 = arith.subf %2, %1 : vector<8x128xf32>
    %4 = vector.broadcast %0 : vector<1x128xf32> to vector<8x128xf32>
    %5 = arith.mulf %3, %4 : vector<8x128xf32>
    %6 = arith.addf %1, %5 : vector<8x128xf32>
    %c0_5 = arith.constant 0 : index
    %c0_6 = arith.constant 0 : index
    %7 = vector.load %arg5[%c0_5, %c0_6] : memref<8x128xf32, #tpu.memory_space<vmem>>, vector<8x128xf32>
    tpu.vector_store %arg5[%c0_5, %c0_6], %6 {strides = array<i32>} : memref<8x128xf32, #tpu.memory_space<vmem>>, vector<8x128xf32>,
    return
  }
  func.func @transform_0(%arg0: i32, %arg1: i32) -> (i32, i32) {
    %c0_i32 = arith.constant 0 : i32
    %c0_i32_0 = arith.constant 0 : i32
    return %c0_i32, %arg1 : i32, i32
  }
  func.func @transform_1(%arg0: i32, %arg1: i32) -> (i32, i32) {
    %c0_i32 = arith.constant 0 : i32
    return %arg0, %arg1 : i32, i32
  }
  func.func @transform_2(%arg0: i32, %arg1: i32) -> (i32, i32) {
    %c0_i32 = arith.constant 0 : i32
    return %arg0, %arg1 : i32, i32
  }
  func.func @transform_3(%arg0: i32, %arg1: i32) -> (i32, i32) {
    %c0_i32 = arith.constant 0 : i32
    return %arg0, %arg1 : i32, i32
  }
}

</mosaic_0001>

<bundles_post_ra>
// kernel: fn.1
= control target key start
LH: loop header
LB: loop body
LE: loop exit
PB: predicated region body
PF: predicated region fallthrough
CT: control target
= control target key end

     0   :  { %s449_s12 = smov 0   ;;  %s451_s13 = smov 0   ;;  %s476_s0 = inlined_call_operand.vmem [shape: f32[1,256], index: 0, kind: input, shape index: {}]   ;;  %s477_s1 = inlined_call_operand.vmem [shape: f32[8,256], index: 1, kind: input, shape index: {}]   ;;  %s478_s2 = inlined_call_operand.vmem [shape: f32[8,256], index: 2, kind: input, shape index: {}]   ;;  %s479_s3 = inlined_call_operand.vmem [shape: f32[8,256], index: 3, kind: output, shape index: {}]  }
   0x1   :  { %s453_s14 = smov 0  }
   0x2 LB: > { %s22_s15 = sadd.s32 1, %s423_s13  ;;  %p374_p0 = scmp.ge.s32.totalorder %s427_s14, 1  ;;  %s427_s14 = sphi %s453_s14, %s13_s14   ;;  %s423_s13 = sphi %s451_s13, %s481_s13   ;;  %s419_s12 = sphi %s449_s12, %s480_s12  }
   0x3   : > { %p23_p1 = scmp.ge.s32.totalorder %s22_s15, 2  ;;  %p179_p2 = scmp.lt.s32.totalorder %s427_s14, 3 }
   0x5   : > { %s483_s15 = smov (%p23_p1, %s22_s15), 0  ;;  %p180_p3 = pnand %p374_p0, %p179_p2 }
   0x6   : > { %p220_p4 = scmp.lt.s32.totalorder (!%p180_p3), %s419_s12, 1 }
   0x7   : > { %183 = sbr.rel (%p180_p3) target bundleno = 26 (0x1a), region = 32 }
   0xe   : > { %s485_s12 = smov (!%p220_p4, %s419_s12), 1 }
   0xf   : > { %s222_s18 = scalar_lea.vmem %s476_s0, %s485_s12  ;;  %s375_s19 = sshll.u32 %s485_s12, 3 }
  0x10   : > { %s230_s22 = scalar_lea.vmem %s477_s1, %s375_s19  ;;  %s238_s25 = scalar_lea.vmem %s478_s2, %s375_s19  ;;  %v378_v0 = vld [vmem:[%s222_s18] ss:$0 sm:$0xff] }
  0x11   : > { %v248_v1 = vld [vmem:[%s238_s25] sm:$0xff]  ;;  %s246_s28 = scalar_lea.vmem %s479_s3, %s375_s19 }
  0x12   : > { %v249_v2 = vld [vmem:[%s230_s22] sm:$0xff] }
  0x13   : > { %v250_v3 = vsub.f32 %v249_v2, %v248_v1 }
  0x15   : > { %v257_v4 = vmul.f32 %v378_v0, %v250_v3 }
  0x17   : > { %v258_v5 = vadd.f32 %v257_v4, %v248_v1 }
  0x19   : > { %259 = vst [vmem:[%s246_s28] sm:$0xff] %v258_v5 }
  0x1a PF: > { %s13_s14 = sadd.s32 1, %s427_s14   ;;  %s480_s12 = smov %s423_s13 }
  0x1b   : > { %p10_p5 = scmp.ge.s32.totalorder %s13_s14, 4   ;;  %s481_s13 = smov %s483_s15 }
  0x1d   :  { %12 = sbr.rel (!%p10_p5) target bundleno = 2 (0x2), region = 68 }

</bundles_post_ra>
